<compile_context>
chip_gen: v6e
topology: v6e:2x2x1
jax: 0.10.0
libtpu: 0.0.40
codegen_flags: <defaults>
</compile_context>

<pallas_src>
import jax
import jax.numpy as jnp
from jax.experimental import pallas as pl
from jax.experimental.pallas import tpu as pltpu  # noqa: F401  (kept for future V-tiled / DMA-gather path)

PAD_TOKEN_ID = 0  # stand-in for data.PAD_TOKEN_ID


# ----------------------------- Pallas kernel -------------------------------
def embed_kernel(ids_ref, tab_ref, w_ref, b_ref, out_ref):
    """Fused CodeDocstringModel embed for ALL branches in one step.

    ids_ref : (NB, L)     int32  token ids (NL rows pre-offset by code_vocab)
    tab_ref : (V2, DP)    f32    concatenated [code; nl] table, PAD rows zero,
                                 columns padded to DP=128 with zeros
    w_ref   : (2, DP, DP) f32    pre-transposed, zero-padded DAN Linear weights
    b_ref   : (2, DP)     f32    zero-padded DAN Linear biases
    out_ref : (NB, DP)    f32    lane-dense output (real data in [:, :D])
    """
    ids = ids_ref[...]                                            # (NB, L)
    L = ids.shape[1]
    V2 = tab_ref.shape[0]

    # counts[b, v] = #occurrences of token v in row b (VPU work only).
    # PAD rows of the concatenated table are zero -> pads contribute nothing.
    vocab_iota = jax.lax.broadcasted_iota(jnp.int32, (1, 1, V2), 2)
    onehot = (ids[:, :, None] == vocab_iota).astype(jnp.float32)  # (NB, L, V2)
    counts = jnp.sum(onehot, axis=1)                              # (NB, V2)

    # embedding-gather + pad-masked sum == one 2-D MXU matmul (V2 = 128 lanes)
    num = jnp.dot(counts, tab_ref[...],
                  preferred_element_type=jnp.float32)             # (NB, DP)

    # avg_ignore_padding denominator straight from counts (PAD is id 0 for
    # every branch).  NOTE: an all-PAD row gives denom=0 -> inf, exactly like
    # the PyTorch reference.
    denom = jnp.float32(L) - counts[:, PAD_TOKEN_ID:PAD_TOKEN_ID + 1]
    avg_emb = num * pl.reciprocal(denom, approx=False)            # (NB, DP)

    # DAN: Linear -> Tanh -> Linear (weights pre-transposed + zero-padded in
    # the wrapper, so padded output lanes stay exactly zero).
    h = jnp.tanh(jnp.dot(avg_emb, w_ref[0],
                         preferred_element_type=jnp.float32) + b_ref[0:1, :])
    out_ref[...] = (jnp.dot(h, w_ref[1],
                            preferred_element_type=jnp.float32) + b_ref[1:2, :])


def embed_pallas(ids_flat, table_cat, w_stack, b_stack):
    """Single pallas_call, single grid step, 4 input streams, lane-dense out.

    ids_flat  : (NB, L)     int32   all branches stacked along rows
    table_cat : (V2, DP)    f32     concatenated [code; nl] embedding table
    w_stack   : (2, DP, DP) f32     pre-transposed zero-padded DAN weights
    b_stack   : (2, DP)     f32     zero-padded DAN biases
    """
    NB, L = ids_flat.shape
    V2, DP = table_cat.shape
    # TODO(synk): for production vocab sizes (V2*DP*4 bytes >> VMEM, esp. the
    # 64 MiB of v7x) tile V2 on a grid axis accumulating counts @ table_tile
    # into a VMEM scratch, or drop the counts formulation entirely and do a
    # DMA row-gather (memory_space=pl.ANY + make_async_copy per id).
    return pl.pallas_call(
        embed_kernel,
        out_shape=jax.ShapeDtypeStruct((NB, DP), jnp.float32),
        grid=(1,),
        in_specs=[
            pl.BlockSpec((NB, L), lambda i: (0, 0)),         # ids
            pl.BlockSpec((V2, DP), lambda i: (0, 0)),         # table
            pl.BlockSpec((2, DP, DP), lambda i: (0, 0, 0)),   # stacked weights
            pl.BlockSpec((2, DP), lambda i: (0, 0)),          # stacked biases
        ],
        out_specs=pl.BlockSpec((NB, DP), lambda i: (0, 0)),
    )(ids_flat, table_cat, w_stack, b_stack)


# ------------------------------- model glue --------------------------------
class CodeDocstringModelPallas:
    def __init__(self, key, margin, code_vocab_size, nl_vocab_size, emb_size):
        self.margin = margin
        self.code_vocab_size = code_vocab_size
        self.nl_vocab_size = nl_vocab_size
        self.emb_size = emb_size
        D = emb_size
        ks = jax.random.split(key, 8)

        def make_emb(k, vocab):
            w = jax.random.normal(k, (vocab, D), jnp.float32) * 0.1
            return w.at[PAD_TOKEN_ID].set(0.0)   # padding_idx row is zero

        self.code_embeddings = make_emb(ks[0], code_vocab_size)
        self.nl_embeddings = make_emb(ks[1], nl_vocab_size)
        # attention params exist in __init__ but are unused in forward
        self.code_attention = jax.random.normal(ks[2], (1, D), jnp.float32)
        self.nl_attention = jax.random.normal(ks[3], (1, D), jnp.float32)
        # DAN: Linear(D,D) -> Tanh -> Linear(D,D)
        self.wa = jax.random.normal(ks[4], (D, D), jnp.float32) * 0.1
        self.ba = jax.random.normal(ks[5], (1, D), jnp.float32) * 0.1
        self.wb = jax.random.normal(ks[6], (D, D), jnp.float32) * 0.1
        self.bb = jax.random.normal(ks[7], (1, D), jnp.float32) * 0.1

        # ---- one-time host-side packing for the kernel ----
        self.DP = max(128, ((D + 127) // 128) * 128)   # lane-dense width
        DP = self.DP

        def pad_cols(x):
            return jnp.pad(x, ((0, 0), (0, DP - x.shape[1])))

        # Concatenated-vocab table: code rows first, NL rows at offset Vc.
        # Both PAD rows (0 and Vc) are zero; NL PAD tokens stay un-offset so
        # they hit row 0 and pad masking is preserved.
        self.table_cat = jnp.concatenate(
            [pad_cols(self.code_embeddings), pad_cols(self.nl_embeddings)],
            axis=0)                                               # (V2, DP)

        def pad_sq(wT):   # pre-transposed (in x out) weight -> (DP, DP)
            return jnp.pad(wT, ((0, DP - wT.shape[0]), (0, DP - wT.shape[1])))

        self.w_stack = jnp.stack([pad_sq(self.wa.T), pad_sq(self.wb.T)])
        self.b_stack = jnp.stack([jnp.pad(self.ba[0], (0, DP - D)),
                                  jnp.pad(self.bb[0], (0, DP - D))])

    # --- helpers -----------------------------------------------------------
    def _offset_nl(self, ids):
        ids = ids.astype(jnp.int32)
        # shift non-PAD NL tokens into the second half of the concat vocab
        return jnp.where(ids != PAD_TOKEN_ID, ids + self.code_vocab_size, ids)

    def _run(self, ids_flat):
        out = embed_pallas(ids_flat, self.table_cat, self.w_stack,
                           self.b_stack)
        return out[:, :self.emb_size]     # strip lane padding outside kernel

    # --- public API (mirrors the PyTorch module) ---------------------------
    def embed_code(self, code):
        return self._run(code.astype(jnp.int32))

    def embed_nl(self, nl):
        return self._run(self._offset_nl(nl))

    def forward(self, code, nl, fake_nl):
        # ALL branches fused into ONE pallas_call with ONE grid step.
        B = code.shape[0]
        ids_flat = jnp.concatenate(
            [code.astype(jnp.int32), self._offset_nl(nl),
             self._offset_nl(fake_nl)], axis=0)                   # (3B, L)
        out = self._run(ids_flat)
        return out[:B], out[B:2 * B], out[2 * B:]


# pure-JAX reference for verification
def _ref_embed(ids, table, wa, ba, wb, bb):
    emb = table[ids]                                        # (B, L, D)
    mask = (ids != PAD_TOKEN_ID).astype(jnp.float32)
    denom = mask.sum(axis=1, keepdims=True)
    avg = (emb * mask[:, :, None]).sum(axis=1) / denom
    h = jnp.tanh(avg @ wa.T + ba)
    return h @ wb.T + bb


if __name__ == "__main__":
    key = jax.random.PRNGKey(0)
    k_model, k_code, k_nl, k_fnl = jax.random.split(key, 4)

    B, L, D = 2, 8, 32
    CODE_V, NL_V = 64, 64

    model = CodeDocstringModelPallas(k_model, margin=0.5,
                                     code_vocab_size=CODE_V,
                                     nl_vocab_size=NL_V, emb_size=D)

    # token ids in [1, V); sprinkle some PAD tokens at the tails
    code = jax.random.randint(k_code, (B, L), 1, CODE_V, jnp.int32)
    nl = jax.random.randint(k_nl, (B, L), 1, NL_V, jnp.int32)
    fake_nl = jax.random.randint(k_fnl, (B, L), 1, NL_V, jnp.int32)
    code = code.at[1, -2:].set(PAD_TOKEN_ID)
    nl = nl.at[1, -3:].set(PAD_TOKEN_ID)
    fake_nl = fake_nl.at[0, -1:].set(PAD_TOKEN_ID)

    code_emb, nl_emb, fake_nl_emb = model.forward(code, nl, fake_nl)
    jax.block_until_ready((code_emb, nl_emb, fake_nl_emb))

    # verify against pure-JAX reference
    ref_code = _ref_embed(code, model.code_embeddings,
                          model.wa, model.ba, model.wb, model.bb)
    ref_nl = _ref_embed(nl, model.nl_embeddings,
                        model.wa, model.ba, model.wb, model.bb)
    ref_fnl = _ref_embed(fake_nl, model.nl_embeddings,
                         model.wa, model.ba, model.wb, model.bb)
    assert jnp.allclose(code_emb, ref_code, atol=1e-5, rtol=1e-5)
    assert jnp.allclose(nl_emb, ref_nl, atol=1e-5, rtol=1e-5)
    assert jnp.allclose(fake_nl_emb, ref_fnl, atol=1e-5, rtol=1e-5)

    print("KERNEL_OK")
</pallas_src>

<mosaic_0001>
module attributes {stable_mosaic.version = 11 : i64} {
  func.func @embed_kernel(%arg0: i32, %arg1: memref<6x8xi32, #tpu.memory_space<vmem>>, %arg2: memref<128x128xf32, #tpu.memory_space<vmem>>, %arg3: memref<2x128x128xf32, #tpu.memory_space<vmem>>, %arg4: memref<2x128xf32, #tpu.memory_space<vmem>>, %arg5: memref<6x128xf32, #tpu.memory_space<vmem>>) attributes {dimension_semantics = [#tpu.dimension_semantics<arbitrary>], iteration_bounds = array<i64: 1>, scalar_prefetch = 0 : i64, scratch_operands = 0 : i64, tpu.core_type = #tpu.core_type<tc>, window_params = [{pipeline_mode = #tpu.pipeline_mode<synchronous>, transform_indices = @transform_0, window_bounds = array<i64: 6, 8>}, {pipeline_mode = #tpu.pipeline_mode<synchronous>, transform_indices = @transform_1, window_bounds = array<i64: 128, 128>}, {pipeline_mode = #tpu.pipeline_mode<synchronous>, transform_indices = @transform_2, window_bounds = array<i64: 2, 128, 128>}, {pipeline_mode = #tpu.pipeline_mode<synchronous>, transform_indices = @transform_3, window_bounds = array<i64: 2, 128>}, {pipeline_mode = #tpu.pipeline_mode<synchronous>, transform_indices = @transform_4, window_bounds = array<i64: 6, 128>}]} {
    %c0 = arith.constant 0 : index
    %c0_0 = arith.constant 0 : index
    %0 = vector.load %arg1[%c0, %c0_0] : memref<6x8xi32, #tpu.memory_space<vmem>>, vector<6x8xi32>
    %1 = tpu.iota {dimensions = array<i32: 2>} : vector<1x1x128xi32>
    %2 = vector.shape_cast %0 : vector<6x8xi32> to vector<6x8x1xi32>
    %3 = vector.broadcast %2 : vector<6x8x1xi32> to vector<6x8x128xi32>
    %4 = vector.broadcast %1 : vector<1x1x128xi32> to vector<6x8x128xi32>
    %5 = arith.cmpi eq, %3, %4 : vector<6x8x128xi32>
    %6 = arith.extui %5 : vector<6x8x128xi1> to vector<6x8x128xi32>
    %7 = arith.sitofp %6 : vector<6x8x128xi32> to vector<6x8x128xf32>
    %cst = arith.constant dense<0.000000e+00> : vector<6x128xf32>
    %8 = vector.multi_reduction <add>, %7, %cst [1] : vector<6x8x128xf32> to vector<6x128xf32>
    %c0_1 = arith.constant 0 : index
    %c0_2 = arith.constant 0 : index
    %9 = vector.load %arg2[%c0_1, %c0_2] : memref<128x128xf32, #tpu.memory_space<vmem>>, vector<128x128xf32>
    %cst_3 = arith.constant dense<0.000000e+00> : vector<6x128xf32>
    %10 = tpu.matmul %8, %9, %cst_3 {dimension_numbers = #tpu.dot_dimension_numbers<[1], [0], [0], [1], [0, 0, 1, 1], [], []>} : vector<6x128xf32>, vector<128x128xf32>, vector<6x128xf32> -> vector<6x128xf32>
    %11 = vector.extract_strided_slice %8 {offsets = [0, 0], sizes = [6, 1], strides = [1, 1]} : vector<6x128xf32> to vector<6x1xf32>
    %cst_4 = arith.constant 8.000000e+00 : f32
    %12 = vector.broadcast %cst_4 : f32 to vector<6x1xf32>
    %13 = arith.subf %12, %11 : vector<6x1xf32>
    %14 = tpu.reciprocal %13 : vector<6x1xf32> -> vector<6x1xf32>
    %15 = vector.broadcast %14 : vector<6x1xf32> to vector<6x128xf32>
    %16 = arith.mulf %10, %15 : vector<6x128xf32>
    %c0_5 = arith.constant 0 : index
    %c0_6 = arith.constant 0 : index
    %c0_7 = arith.constant 0 : index
    %17 = vector.load %arg3[%c0_5, %c0_6, %c0_7] : memref<2x128x128xf32, #tpu.memory_space<vmem>>, vector<1x128x128xf32>
    %18 = vector.shape_cast %17 : vector<1x128x128xf32> to vector<128x128xf32>
    %cst_8 = arith.constant dense<0.000000e+00> : vector<6x128xf32>
    %19 = tpu.matmul %16, %18, %cst_8 {dimension_numbers = #tpu.dot_dimension_numbers<[1], [0], [0], [1], [0, 0, 1, 1], [], []>} : vector<6x128xf32>, vector<128x128xf32>, vector<6x128xf32> -> vector<6x128xf32>
    %c0_9 = arith.constant 0 : index
    %c0_10 = arith.constant 0 : index
    %20 = vector.load %arg4[%c0_9, %c0_10] : memref<2x128xf32, #tpu.memory_space<vmem>>, vector<1x128xf32>
    %21 = vector.broadcast %20 : vector<1x128xf32> to vector<6x128xf32>
    %22 = arith.addf %19, %21 : vector<6x128xf32>
    %23 = math.tanh %22 : vector<6x128xf32>
    %c1 = arith.constant 1 : index
    %c0_11 = arith.constant 0 : index
    %c0_12 = arith.constant 0 : index
    %24 = vector.load %arg3[%c1, %c0_11, %c0_12] : memref<2x128x128xf32, #tpu.memory_space<vmem>>, vector<1x128x128xf32>
    %25 = vector.shape_cast %24 : vector<1x128x128xf32> to vector<128x128xf32>
    %cst_13 = arith.constant dense<0.000000e+00> : vector<6x128xf32>
    %26 = tpu.matmul %23, %25, %cst_13 {dimension_numbers = #tpu.dot_dimension_numbers<[1], [0], [0], [1], [0, 0, 1, 1], [], []>} : vector<6x128xf32>, vector<128x128xf32>, vector<6x128xf32> -> vector<6x128xf32>
    %c1_14 = arith.constant 1 : index
    %c0_15 = arith.constant 0 : index
    %27 = vector.load %arg4[%c1_14, %c0_15] : memref<2x128xf32, #tpu.memory_space<vmem>>, vector<1x128xf32>
    %28 = vector.broadcast %27 : vector<1x128xf32> to vector<6x128xf32>
    %29 = arith.addf %26, %28 : vector<6x128xf32>
    %c0_16 = arith.constant 0 : index
    %c0_17 = arith.constant 0 : index
    %30 = vector.load %arg5[%c0_16, %c0_17] : memref<6x128xf32, #tpu.memory_space<vmem>>, vector<6x128xf32>
    tpu.vector_store %arg5[%c0_16, %c0_17], %29 {strides = array<i32>} : memref<6x128xf32, #tpu.memory_space<vmem>>, vector<6x128xf32>,
    return
  }
  func.func @transform_0(%arg0: i32) -> (i32, i32) {
    %c0_i32 = arith.constant 0 : i32
    %c0_i32_0 = arith.constant 0 : i32
    %c0_i32_1 = arith.constant 0 : i32
    return %c0_i32, %c0_i32_0 : i32, i32
  }
  func.func @transform_1(%arg0: i32) -> (i32, i32) {
    %c0_i32 = arith.constant 0 : i32
    %c0_i32_0 = arith.constant 0 : i32
    %c0_i32_1 = arith.constant 0 : i32
    return %c0_i32, %c0_i32_0 : i32, i32
  }
  func.func @transform_2(%arg0: i32) -> (i32, i32, i32) {
    %c0_i32 = arith.constant 0 : i32
    %c0_i32_0 = arith.constant 0 : i32
    %c0_i32_1 = arith.constant 0 : i32
    %c0_i32_2 = arith.constant 0 : i32
    return %c0_i32, %c0_i32_0, %c0_i32_1 : i32, i32, i32
  }
  func.func @transform_3(%arg0: i32) -> (i32, i32) {
    %c0_i32 = arith.constant 0 : i32
    %c0_i32_0 = arith.constant 0 : i32
    %c0_i32_1 = arith.constant 0 : i32
    return %c0_i32, %c0_i32_0 : i32, i32
  }
  func.func @transform_4(%arg0: i32) -> (i32, i32) {
    %c0_i32 = arith.constant 0 : i32
    %c0_i32_0 = arith.constant 0 : i32
    %c0_i32_1 = arith.constant 0 : i32
    return %c0_i32, %c0_i32_0 : i32, i32
  }
}

</mosaic_0001>

<bundles_post_ra>
// kernel: tpu_custom_call.1
= control target key start
LH: loop header
LB: loop body
LE: loop exit
PB: predicated region body
PF: predicated region fallthrough
CT: control target
= control target key end

     0   :  { %9 = vsyncpa [#allocation3], 0  ;;  %s902_s0 = inlined_call_operand.hbm [shape: s32[6,8], index: 0, kind: input, shape index: {}]   ;;  %s903_s1 = inlined_call_operand.hbm [shape: f32[128,128], index: 1, kind: input, shape index: {}]   ;;  %s904_s2 = inlined_call_operand.hbm [shape: f32[2,128,128], index: 2, kind: input, shape index: {}]   ;;  %s905_s3 = inlined_call_operand.vmem [shape: f32[2,128], index: 3, kind: input, shape index: {}]   ;;  %s906_s4 = inlined_call_operand.hbm [shape: f32[6,128], index: 4, kind: output, shape index: {}]  }
   0x1   :  { %10 = vsyncpa [#allocation6], 0 }
   0x2   :  { %11 = vsyncpa [#allocation4], 0  ;;  %s778_s15 = smov [#allocation5]  }
   0x3   :  { %s27_s16 = sshll.u32 %s778_s15, 4  ;;  %s28_s16 = int_to_ptr.vmem [resolvable:$true] %s27_s16 }
   0x4   :  { %s700_s17 = scalar_lea.vmem %s28_s16, 2048  ;;  %p705_p1 = scmp.lt.s32.totalorder %s28_s16, %s28_s16 }
   0x5   :  { %p701_p0 = scmp.ne.s32.totalorder %s28_s16, %s700_s17  ;;  %p706_p2 = scmp.lt.s32.totalorder %s700_s17, %s700_s17 }
   0x7   :  { %p707_p3 = por %p706_p2, %p705_p1 }
   0x9   :  { %p708_p4 = pnand %p707_p3, %p701_p0 }
   0xb   :  { %711 = shalt.err (!%p708_p4)
}
   0xc   :  { %s779_s18 = smov 128   ;;  %s780_s19 = smov 8  }
   0xd   :  { %33 = dma.hbm_to_vmem [thread:$0]  %s903_s1, 2048, %s28_s16, [#allocation6], %s779_s18, %s779_s18, %s780_s19  }
   0xe   :  { %s781_s22 = smov [#allocation2]   ;;  %s782_s24 = smov [#allocation7]  }
   0xf   :  { %s18_s23 = sshll.u32 %s781_s22, 4  ;;  %s39_s25 = sshll.u32 %s782_s24, 4  ;;  %s19_s23 = int_to_ptr.vmem [resolvable:$true] %s18_s23  ;;  %s40_s25 = int_to_ptr.vmem [resolvable:$true] %s39_s25 }
  0x10   :  { %s720_s26 = scalar_lea.vmem %s19_s23, 128  ;;  %p725_p6 = scmp.lt.s32.totalorder %s19_s23, %s19_s23 }
  0x11   :  { %p721_p5 = scmp.ne.s32.totalorder %s19_s23, %s720_s26  ;;  %p726_p7 = scmp.lt.s32.totalorder %s720_s26, %s720_s26 }
  0x13   :  { %p727_p8 = por %p726_p7, %p725_p6 }
  0x15   :  { %p728_p9 = pnand %p727_p8, %p721_p5 }
  0x17   :  { %731 = shalt.err (!%p728_p9)
}
  0x18   :  { %21 = dma.hbm_to_vmem [thread:$0]  %s902_s0, 128, %s19_s23, [#allocation3]  }
  0x19   :  { %s740_s29 = scalar_lea.vmem %s40_s25, 4096  ;;  %p745_p11 = scmp.lt.s32.totalorder %s40_s25, %s40_s25 }
  0x1a   :  { %p741_p10 = scmp.ne.s32.totalorder %s40_s25, %s740_s29  ;;  %p746_p12 = scmp.lt.s32.totalorder %s740_s29, %s740_s29 }
  0x1c   :  { %p747_p13 = por %p746_p12, %p745_p11 }
  0x1e   :  { %p748_p0 = pnand %p747_p13, %p741_p10 }
  0x20   :  { %751 = shalt.err (!%p748_p0)
}
  0x21   :  { %45 = dma.hbm_to_vmem [thread:$0]  %s904_s2, 4096, %s40_s25, [#allocation6], %s779_s18, %s779_s18, %s780_s19  }
  0x22   :  { %772 = dma.done.wait [#allocation3], 128  }
  0x23   :  { %773 = vsyncadd [#allocation3], 4294967168 }
  0x24   :  { %774 = dma.done.wait [#allocation6], 6144  }
  0x25   :  { %775 = vsyncadd [#allocation6], 4294961152  ;;  %v58_v0 = vlaneseq  ;;  %v783_v1 = vmov 0.0   ;;  %v57_v7 = vld [vmem:[#allocation2] sm:$0x3f]  ;;  %v170_v11 = vld [vmem:[#allocation5 + $0x70] sm:$0xff] }
  0x26   :  { %562 = vmatprep.subr.mxu0 %v783_v1  ;;  %597 = vmatprep.subr.mxu1 %v783_v1  ;;  %v171_v8 = vld [vmem:[#allocation5 + $0x78] sm:$0xff]  ;;  %v169_v16 = vld [vmem:[#allocation5 + $0x68] sm:$0xff]  ;;  %v168_v17 = vld [vmem:[#allocation5 + $0x60] sm:$0xff]  ;;  %vm784_vm0 = vmmov 0   ;;  %v785_v26 = vmov 0   ;;  %vm178_vm7 = vcmask 1041409  }
  0x27   :  { %v61_v2 = vshrl.u32 %v58_v0, 7  ;;  %563 = vmatpush3.msra.mxu0 %v171_v8  ;;  %v167_v20 = vld [vmem:[#allocation5 + $0x58] sm:$0xff]  ;;  %v166_v21 = vld [vmem:[#allocation5 + $0x50] sm:$0xff]  ;;  %v165_v22 = vld [vmem:[#allocation5 + $0x48] sm:$0xff]  ;;  %594 = vmatprep.mubr.msk.f32.mxu0 %vm784_vm0, %v783_v1  ;;  %v59_v33 = vand.u32 127, %v58_v0  ;;  %vm180_vm8 = vcmask 1042434  }
  0x28   :  { %564 = vmatprep.subr.mxu0 %v783_v1  ;;  %v164_v23 = vld [vmem:[#allocation5 + $0x40] sm:$0xff]  ;;  %v163_v24 = vld [vmem:[#allocation5 + $0x38] sm:$0xff]  ;;  %629 = vmatprep.mubr.msk.f32.mxu1 %vm784_vm0, %v783_v1  ;;  %v162_v25 = vld [vmem:[#allocation5 + $0x30] sm:$0xff]  ;;  %vm182_vm9 = vcmask 1043459   ;;  %vm184_vm10 = vcmask 1044484   ;;  %vm186_vm11 = vcmask 1045509  }
  0x29   :  { %v76_v3 = vsub.s32 2, %v61_v2  ;;  %v62_v4 = vsub.s32 0, %v61_v2  ;;  %v83_v5 = vsub.s32 3, %v61_v2  ;;  %v69_v6 = vsub.s32 1, %v61_v2  ;;  %565 = vmatpush3.msra.mxu0 %v170_v11  ;;  %676 = vset.pattern.permute.xlu0 %v785_v26  ;;  %v161_v27 = vld [vmem:[#allocation5 + $0x28] sm:$0xff]  ;;  %v160_v28 = vld [vmem:[#allocation5 + $0x20] sm:$0xff] }
  0x2a   :  { %v97_v14 = vsub.s32 5, %v61_v2  ;;  %v90_v15 = vsub.s32 4, %v61_v2  ;;  %566 = vmatprep.subr.mxu0 %v783_v1  ;;  %677 = vset.pattern.permute.xlu1 %v785_v26  ;;  %v159_v29 = vld [vmem:[#allocation5 + $0x18] sm:$0xff]  ;;  %v158_v30 = vld [vmem:[#allocation5 + $0x10] sm:$0xff]  ;;  %v157_v31 = vld [vmem:[#allocation5 + $0x8] sm:$0xff]  ;;  %s786_s7 = smov [#allocation8]  }
  0x2b   :  { %v77_v9 = vrot.slane %v57_v7, %v76_v3  ;;  %v63_v10 = vrot.slane %v57_v7, %v62_v4  ;;  %v84_v12 = vrot.slane %v57_v7, %v83_v5  ;;  %v70_v13 = vrot.slane %v57_v7, %v69_v6  ;;  %567 = vmatpush3.msra.mxu0 %v169_v16  ;;  %v156_v32 = vld [vmem:[#allocation5] sm:$0xff]  ;;  %s493_s8 = sshll.u32 %s786_s7, 4  ;;  %s494_s8 = int_to_ptr.vmem [resolvable:$true] %s493_s8 }
  0x2c   :  { %v98_v18 = vrot.slane %v57_v7, %v97_v14  ;;  %v91_v19 = vrot.slane %v57_v7, %v90_v15  ;;  %568 = vmatprep.subr.mxu0 %v783_v1  ;;  %s752_s9 = scalar_lea.vmem %s494_s8, 128  ;;  %p757_p2 = scmp.lt.s32.totalorder %s494_s8, %s494_s8 }
  0x2d   :  { %79 = vbcast.lane.b32.xlu1 %v77_v9, 256  ;;  %65 = vbcast.lane.b32.xlu0 %v63_v10, 256  ;;  %p753_p1 = scmp.ne.s32.totalorder %s494_s8, %s752_s9  ;;  %p758_p3 = scmp.lt.s32.totalorder %s752_s9, %s752_s9 }
  0x2e   :  { %569 = vmatpush3.msra.mxu0 %v168_v17 }
  0x2f   :  { %570 = vmatprep.subr.mxu0 %v783_v1  ;;  %p759_p4 = por %p758_p3, %p757_p2 }
  0x30   :  { %571 = vmatpush3.msra.mxu0 %v167_v20 }
  0x31   :  { %86 = vbcast.lane.b32.xlu1 %v84_v12, 256  ;;  %72 = vbcast.lane.b32.xlu0 %v70_v13, 256  ;;  %p760_p5 = pnand %p759_p4, %p753_p1 }
  0x32   :  { %572 = vmatprep.subr.mxu0 %v783_v1 }
  0x33   :  { %573 = vmatpush3.msra.mxu0 %v166_v21 }
  0x34   :  { %574 = vmatprep.subr.mxu0 %v783_v1 }
  0x35   :  { %100 = vbcast.lane.b32.xlu1 %v98_v18, 256  ;;  %93 = vbcast.lane.b32.xlu0 %v91_v19, 256 }
  0x36   :  { %575 = vmatpush3.msra.mxu0 %v165_v22 }
  0x37   :  { %576 = vmatprep.subr.mxu0 %v783_v1 }
  0x38   :  { %577 = vmatpush3.msra.mxu0 %v164_v23 }
  0x39   :  { %578 = vmatprep.subr.mxu0 %v783_v1 }
  0x3a   :  { %579 = vmatpush3.msra.mxu0 %v163_v24 }
  0x3b   :  { %580 = vmatprep.subr.mxu0 %v783_v1 }
  0x3c   :  { %581 = vmatpush3.msra.mxu0 %v162_v25 }
  0x3d   :  { %582 = vmatprep.subr.mxu0 %v783_v1 }
  0x3e   :  { %583 = vmatpush3.msra.mxu0 %v161_v27 }
  0x3f   :  { %584 = vmatprep.subr.mxu0 %v783_v1 }
  0x40   :  { %585 = vmatpush3.msra.mxu0 %v160_v28 }
  0x41   :  { %586 = vmatprep.subr.mxu0 %v783_v1 }
  0x42   :  { %587 = vmatpush3.msra.mxu0 %v159_v29 }
  0x43   :  { %588 = vmatprep.subr.mxu0 %v783_v1 }
  0x44   :  { %589 = vmatpush3.msra.mxu0 %v158_v30 }
  0x45   :  { %590 = vmatprep.subr.mxu0 %v783_v1 }
  0x46   :  { %591 = vmatpush3.msra.mxu0 %v157_v31 }
  0x47   :  { %592 = vmatprep.subr.mxu0 %v783_v1 }
  0x48   :  { %593 = vmatpush3.msra.mxu0 %v156_v32 }
  0x49   :  { %632 = vmatprep.subr.mxu0 %v783_v1 }
  0x9f   :  { %v80_v34 = vpop.permute.xlu1 %79  ;;  %v66_v35 = vpop.permute.xlu0 %65 }
  0xa0   :  { %vm104_vm1 = vcmp.eq.s32.totalorder %v80_v34, %v59_v33  ;;  %vm102_vm2 = vcmp.eq.s32.totalorder %v66_v35, %v59_v33  ;;  %v317_v34 = vld [vmem:[#allocation7 + $0x78] sm:$0xff]  ;;  %v316_v35 = vld [vmem:[#allocation7 + $0x70] sm:$0xff] }
  0xa1   :  { %v505_v36 = vsel %vm104_vm1, 1.0, %v783_v1  ;;  %v503_v37 = vsel %vm102_vm2, 1.0, %v783_v1  ;;  %598 = vmatpush3.msra.mxu1 %v317_v34 }
  0xa2   :  { %v132_v38 = vrot.slane %v505_v36, 4  ;;  %v120_v39 = vrot.slane %v503_v37, 4  ;;  %599 = vmatprep.subr.mxu1 %v783_v1 }
  0xa3   :  { %v87_v40 = vpop.permute.xlu1 %86  ;;  %v73_v41 = vpop.permute.xlu0 %72  ;;  %600 = vmatpush3.msra.mxu1 %v316_v35 }
  0xa4   :  { %v133_v42 = vadd.f32 %v505_v36, %v132_v38  ;;  %v121_v43 = vadd.f32 %v503_v37, %v120_v39  ;;  %vm105_vm3 = vcmp.eq.s32.totalorder %v87_v40, %v59_v33  ;;  %vm103_vm4 = vcmp.eq.s32.totalorder %v73_v41, %v59_v33  ;;  %v315_v37 = vld [vmem:[#allocation7 + $0x68] sm:$0xff]  ;;  %601 = vmatprep.subr.mxu1 %v783_v1  ;;  %v314_v39 = vld [vmem:[#allocation7 + $0x60] sm:$0xff]  ;;  %v313_v40 = vld [vmem:[#allocation7 + $0x58] sm:$0xff] }
  0xa5   :  { %v506_v44 = vsel %vm105_vm3, 1.0, %v783_v1  ;;  %v504_v45 = vsel %vm103_vm4, 1.0, %v783_v1  ;;  %602 = vmatpush3.msra.mxu1 %v315_v37  ;;  %v312_v41 = vld [vmem:[#allocation7 + $0x50] sm:$0xff] }
  0xa6   :  { %v134_v46 = vrot.slane %v133_v42, 2  ;;  %v122_v47 = vrot.slane %v121_v43, 2  ;;  %v138_v48 = vrot.slane %v506_v44, 4  ;;  %v126_v49 = vrot.slane %v504_v45, 4  ;;  %603 = vmatprep.subr.mxu1 %v783_v1 }
  0xa7   :  { %v101_v50 = vpop.permute.xlu1 %100  ;;  %v94_v51 = vpop.permute.xlu0 %93  ;;  %604 = vmatpush3.msra.mxu1 %v314_v39 }
  0xa8   :  { %v123_v52 = vadd.f32 %v122_v47, %v121_v43  ;;  %v139_v53 = vadd.f32 %v506_v44, %v138_v48  ;;  %v127_v54 = vadd.f32 %v504_v45, %v126_v49  ;;  %v135_v55 = vadd.f32 %v134_v46, %v133_v42  ;;  %605 = vmatprep.subr.mxu1 %v783_v1  ;;  %v311_v42 = vld [vmem:[#allocation7 + $0x48] sm:$0xff]  ;;  %v310_v43 = vld [vmem:[#allocation7 + $0x40] sm:$0xff]  ;;  %v309_v44 = vld [vmem:[#allocation7 + $0x38] sm:$0xff] }
  0xa9   :  { %vm107_vm5 = vcmp.eq.s32.totalorder %v101_v50, %v59_v33  ;;  %vm106_vm6 = vcmp.eq.s32.totalorder %v94_v51, %v59_v33  ;;  %606 = vmatpush3.msra.mxu1 %v313_v40  ;;  %v308_v45 = vld [vmem:[#allocation7 + $0x30] sm:$0xff]  ;;  %v307_v46 = vld [vmem:[#allocation7 + $0x28] sm:$0xff]  ;;  %v306_v47 = vld [vmem:[#allocation7 + $0x20] sm:$0xff] }
  0xaa   :  { %v124_v56 = vrot.slane %v123_v52, 1  ;;  %v140_v57 = vrot.slane %v139_v53, 2  ;;  %v128_v58 = vrot.slane %v127_v54, 2  ;;  %v508_v59 = vsel %vm107_vm5, 1.0, %v783_v1  ;;  %607 = vmatprep.subr.mxu1 %v783_v1  ;;  %v305_v48 = vld [vmem:[#allocation7 + $0x18] sm:$0xff]  ;;  %v304_v49 = vld [vmem:[#allocation7 + $0x10] sm:$0xff] }
  0xab   :  { %v507_v60 = vsel %vm106_vm6, 1.0, %v783_v1  ;;  %v136_v0 = vrot.slane %v135_v55, 1  ;;  %v150_v2 = vrot.slane %v508_v59, 4  ;;  %608 = vmatpush3.msra.mxu1 %v312_v41  ;;  %v303_v50 = vld [vmem:[#allocation7 + $0x8] sm:$0xff]  ;;  %v302_v51 = vld [vmem:[#allocation7] sm:$0xff] }
  0xac   :  { %v125_v61 = vadd.f32 %v124_v56, %v123_v52  ;;  %v141_v62 = vadd.f32 %v140_v57, %v139_v53  ;;  %v129_v63 = vadd.f32 %v128_v58, %v127_v54  ;;  %v144_v3 = vrot.slane %v507_v60, 4  ;;  %609 = vmatprep.subr.mxu1 %v783_v1  ;;  %v410_v52 = vld [vmem:[#allocation7 + $0xf8] sm:$0xff]  ;;  %v409_v53 = vld [vmem:[#allocation7 + $0xf0] sm:$0xff]  ;;  %v408_v54 = vld [vmem:[#allocation7 + $0xe8] sm:$0xff] }
  0xad   :  { %v151_v7 = vadd.f32 %v508_v59, %v150_v2  ;;  %v137_v11 = vadd.f32 %v136_v0, %v135_v55  ;;  %610 = vmatpush3.msra.mxu1 %v311_v42  ;;  %v407_v55 = vld [vmem:[#allocation7 + $0xe0] sm:$0xff]  ;;  %v406_v56 = vld [vmem:[#allocation7 + $0xd8] sm:$0xff]  ;;  %v405_v57 = vld [vmem:[#allocation7 + $0xd0] sm:$0xff] }
  0xae   :  { %v259_v4 = vsub.f32 8.0, %v125_v61  ;;  %v142_v5 = vrot.slane %v141_v62, 1  ;;  %v130_v6 = vrot.slane %v129_v63, 1  ;;  %v145_v8 = vadd.f32 %v507_v60, %v144_v3  ;;  %611 = vmatprep.subr.mxu1 %v783_v1  ;;  %v404_v58 = vld [vmem:[#allocation7 + $0xc8] sm:$0xff] }
  0xaf   :  { %v152_v12 = vrot.slane %v151_v7, 2  ;;  %v261_v20 = vsub.f32 8.0, %v137_v11  ;;  %612 = vmatpush3.msra.mxu1 %v310_v43 }
  0xb0   :  { %v143_v9 = vadd.f32 %v142_v5, %v141_v62  ;;  %v131_v10 = vadd.f32 %v130_v6, %v129_v63  ;;  %678 = vrcp.f32 %v259_v4  ;;  %v146_v13 = vrot.slane %v145_v8, 2  ;;  %613 = vmatprep.subr.mxu1 %v783_v1 }
  0xb1   :  { %v153_v17 = vadd.f32 %v152_v12, %v151_v7  ;;  %614 = vmatpush3.msra.mxu1 %v309_v44  ;;  %v401_v12 = vld [vmem:[#allocation7 + $0xb0] sm:$0xff] }
  0xb2   :  { %v262_v14 = vsub.f32 8.0, %v143_v9  ;;  %v260_v15 = vsub.f32 8.0, %v131_v10  ;;  %v179_v16 = vsel %vm178_vm7, %v131_v10, %v125_v61  ;;  %v147_v18 = vadd.f32 %v146_v13, %v145_v8  ;;  %615 = vmatprep.subr.mxu1 %v783_v1  ;;  %v403_v10 = vld [vmem:[#allocation7 + $0xc0] sm:$0xff]  ;;  %v400_v13 = vld [vmem:[#allocation7 + $0xa8] sm:$0xff] }
  0xb3   :  { %v181_v19 = vsel %vm180_vm8, %v137_v11, %v179_v16  ;;  %v154_v21 = vrot.slane %v153_v17, 1  ;;  %616 = vmatpush3.msra.mxu1 %v308_v45  ;;  %v402_v11 = vld [vmem:[#allocation7 + $0xb8] sm:$0xff]  ;;  %v397_v16 = vld [vmem:[#allocation7 + $0x90] sm:$0xff] }
  0xb4   :  { %680 = vrcp.f32 %v262_v14  ;;  %v148_v22 = vrot.slane %v147_v18, 1  ;;  %v183_v23 = vsel %vm182_vm9, %v143_v9, %v181_v19  ;;  %617 = vmatprep.subr.mxu1 %v783_v1  ;;  %v399_v14 = vld [vmem:[#allocation7 + $0xa0] sm:$0xff]  ;;  %v509_v19 = vld [vmem:[%s905_s3] ss:$0 sm:$0xff] }
  0xb5   :  { %682 = vrcp.f32 %v260_v15  ;;  %v155_v25 = vadd.f32 %v154_v21, %v153_v17  ;;  %618 = vmatpush3.msra.mxu1 %v307_v46  ;;  %v398_v15 = vld [vmem:[#allocation7 + $0x98] sm:$0xff]  ;;  %v396_v17 = vld [vmem:[#allocation7 + $0x88] sm:$0xff] }
  0xb6   :  { %v149_v24 = vadd.f32 %v148_v22, %v147_v18  ;;  %684 = vrcp.f32 %v261_v20  ;;  %619 = vmatprep.subr.mxu1 %v783_v1  ;;  %v395_v18 = vld [vmem:[#allocation7 + $0x80] sm:$0xff] }
  0xb7   :  { %v264_v28 = vsub.f32 8.0, %v155_v25  ;;  %620 = vmatpush3.msra.mxu1 %v306_v47 }
  0xb8   :  { %v263_v26 = vsub.f32 8.0, %v149_v24  ;;  %v185_v27 = vsel %vm184_vm10, %v149_v24, %v183_v23  ;;  %621 = vmatprep.subr.mxu1 %v783_v1  ;;  %v510_v24 = vld [vmem:[%s905_s3 + $0x1] ss:$0 sm:$0xff] }
  0xb9   :  { %v187_v29 = vsel %vm186_vm11, %v155_v25, %v185_v27  ;;  %686 = vrcp.f32 %v264_v28  ;;  %622 = vmatpush3.msra.mxu1 %v305_v48 }
  0xba   :  { %595 = vmatmul.mubr.f32.vlgmr.msra.gmra.mxu0 %v187_v29  ;;  %688 = vrcp.f32 %v263_v26  ;;  %623 = vmatprep.subr.mxu1 %v783_v1 }
  0xbb   :  { %664 = vmatprep.mubr.msk.f32.mxu0 %vm784_vm0, %v783_v1  ;;  %624 = vmatpush3.msra.mxu1 %v304_v49 }
  0xbc   :  { %625 = vmatprep.subr.mxu1 %v783_v1  ;;  %633 = vmatpush3.msra.mxu0 %v410_v52 }
  0xbd   :  { %v679_v30 = vpop.eup %678  ;;  %626 = vmatpush3.msra.mxu1 %v303_v50  ;;  %634 = vmatprep.subr.mxu0 %v783_v1 }
  0xbe   :  { %273 = vperm.xlu0 %676, %v679_v30   ;;  %627 = vmatprep.subr.mxu1 %v783_v1 }
  0xbf   :  { %628 = vmatpush3.msra.mxu1 %v302_v51  ;;  %635 = vmatpush3.msra.mxu0 %v409_v53 }
  0xc0   :  { %636 = vmatprep.subr.mxu0 %v783_v1 }
  0xc1   :  { %v681_v31 = vpop.eup %680  ;;  %637 = vmatpush3.msra.mxu0 %v408_v54 }
  0xc2   :  { %v683_v32 = vpop.eup %682  ;;  %285 = vperm.xlu0 %676, %v681_v31   ;;  %638 = vmatprep.subr.mxu0 %v783_v1 }
  0xc3   :  { %277 = vperm.xlu1 %677, %v683_v32   ;;  %v685_v33 = vpop.eup %684  ;;  %639 = vmatpush3.msra.mxu0 %v407_v55 }
  0xc4   :  { %640 = vmatprep.subr.mxu0 %v783_v1 }
  0xc5   :  { %641 = vmatpush3.msra.mxu0 %v406_v56 }
  0xc6   :  { %v687_v36 = vpop.eup %686  ;;  %642 = vmatprep.subr.mxu0 %v783_v1 }
  0xc7   :  { %281 = vperm.xlu1 %677, %v685_v33   ;;  %v689_v38 = vpop.eup %688  ;;  %293 = vperm.xlu0 %676, %v687_v36  }
  0xc8   :  { %643 = vmatpush3.msra.mxu0 %v405_v57 }
  0xc9   :  { %644 = vmatprep.subr.mxu0 %v783_v1 }
  0xca   :  { %645 = vmatpush3.msra.mxu0 %v404_v58 }
  0xcb   :  { %289 = vperm.xlu1 %677, %v689_v38   ;;  %646 = vmatprep.subr.mxu0 %v783_v1 }
  0xcc   :  { %647 = vmatpush3.msra.mxu0 %v403_v10 }
  0xcd   :  { %648 = vmatprep.subr.mxu0 %v783_v1 }
  0xce   :  { %649 = vmatpush3.msra.mxu0 %v402_v11 }
  0xcf   :  { %650 = vmatprep.subr.mxu0 %v783_v1 }
  0xd0   :  { %651 = vmatpush3.msra.mxu0 %v401_v12 }
  0xd1   :  { %652 = vmatprep.subr.mxu0 %v783_v1 }
  0xd2   :  { %653 = vmatpush3.msra.mxu0 %v400_v13 }
  0xd3   :  { %654 = vmatprep.subr.mxu0 %v783_v1 }
  0xd4   :  { %655 = vmatpush3.msra.mxu0 %v399_v14 }
  0xd5   :  { %656 = vmatprep.subr.mxu0 %v783_v1 }
  0xd6   :  { %657 = vmatpush3.msra.mxu0 %v398_v15 }
  0xd7   :  { %658 = vmatprep.subr.mxu0 %v783_v1 }
  0xd8   :  { %659 = vmatpush3.msra.mxu0 %v397_v16 }
  0xd9   :  { %660 = vmatprep.subr.mxu0 %v783_v1 }
  0xda   :  { %661 = vmatpush3.msra.mxu0 %v396_v17 }
  0xdb   :  { %662 = vmatprep.subr.mxu0 %v783_v1 }
  0xdc   :  { %663 = vmatpush3.msra.mxu0 %v395_v18 }
 0x139   :  { %v274_v60 = vpop.permute.xlu0 %273 }
 0x13d   :  { %v286_v63 = vpop.permute.xlu0 %285 }
 0x13e   :  { %v278_v59 = vpop.permute.xlu1 %277 }
 0x13f   :  { %v295_v62 = vsel %vm178_vm7, %v278_v59, %v274_v60 }
 0x142   :  { %v282_v61 = vpop.permute.xlu1 %281  ;;  %v294_v5 = vpop.permute.xlu0 %293 }
 0x143   :  { %v296_v0 = vsel %vm180_vm8, %v282_v61, %v295_v62 }
 0x144   :  { %v297_v3 = vsel %vm182_vm9, %v286_v63, %v296_v0 }
 0x146   :  { %v290_v2 = vpop.permute.xlu1 %289 }
 0x147   :  { %v298_v4 = vsel %vm184_vm10, %v290_v2, %v297_v3 }
 0x148   :  { %v299_v7 = vsel %vm186_vm11, %v294_v5, %v298_v4 }
 0x17a   :  { %v255_v6 = vpop.f32.mrf.mxu0 }
 0x17b   :  { %v301_v8 = vmul.f32 %v299_v7, %v255_v6 }
 0x17c   :  { %v596_v9 = vpop.f32.mrf.mxu0 }
 0x17d   :  { %630 = vmatmul.mubr.f32.vlgmr.msra.gmra.mxu1 %v301_v8 }
 0x23d   :  { %v389_v20 = vpop.f32.mrf.mxu1 }
 0x23e   :  { %v390_v21 = vadd.f32 %v509_v19, %v389_v20 }
 0x23f   :  { %v631_v22 = vpop.f32.mrf.mxu1 }
 0x240   :  { %690 = vtanh.f32 %v390_v21 }
 0x24d   :  { %v691_v23 = vpop.eup %690 }
 0x24e   :  { %665 = vmatmul.mubr.f32.vlgmr.msra.gmra.mxu0 %v691_v23 }
 0x30e   :  { %v482_v25 = vpop.f32.mrf.mxu0 }
 0x30f   :  { %v483_v26 = vadd.f32 %v510_v24, %v482_v25 }
 0x310   :  { %v666_v1 = vpop.f32.mrf.mxu0 }
 0x311   :  { %486 = vst [vmem:[#allocation8] sm:$0x3f] %v483_v26 }
 0x312   :  { %763 = shalt.err (!%p760_p5)
}
 0x313   :  { %496 = dma.vmem_to_hbm [thread:$0]  %s494_s8, 128, %s906_s4, [#allocation4]  }
 0x314   :  { %776 = dma.done.wait [#allocation4], 128  }
 0x315   :  { %777 = vsyncadd [#allocation4], 4294967168 }
 0x316   :  { %500 = vsyncpa [#allocation3], 1 }
 0x317   :  { %501 = vsyncpa [#allocation6], 1 }
 0x318   :  { %502 = vsyncpa [#allocation4], 1 }

</bundles_post_ra>
